<compile_context>
chip_gen: v7x
topology: tpu7x:2x2x1
jax: 0.10.0
libtpu: 0.0.40
codegen_flags: <defaults>
</compile_context>

<pallas_src>
import jax
import jax.numpy as jnp
from jax.experimental import pallas as pl
from jax.experimental.pallas import tpu as pltpu


_MAX_T_HW = 32768               # cap on spatial columns per tile
_MAX_BATCH_BLOCK = 16           # max batch elements per grid step (kept unrolled)
_TARGET_BLOCK_BYTES = 2 << 20   # aim for ~2 MiB input blocks when packing batch


def _vmem_capacity_bytes():
    """Physical VMEM of the local TPU; conservative (v7x = 64 MiB) fallback."""
    try:
        cap = getattr(pltpu.get_tpu_info(), "vmem_capacity_bytes", None)
        if cap:
            return int(cap)
    except Exception:
        pass
    return 64 << 20


def _choose_tiling(N, C_in, C_out, HW, itemsize, vmem_cap):
    """Pick (n_blk, t_hw): batch elements per step and spatial columns per tile."""
    # Bytes of double-buffered input+output blocks per spatial column.
    per_col = 2 * (C_in + C_out) * itemsize
    budget = max(vmem_cap // 3, 8 << 20)        # headroom for weights / compiler scratch

    max_thw = max(128, budget // max(per_col, 1))
    if HW <= max_thw and HW <= _MAX_T_HW:
        t_hw = HW                                # full spatial extent: no 128-multiple rule
    else:
        t_hw = min(HW, _MAX_T_HW, max_thw)
        t_hw = max(128, (t_hw // 128) * 128)     # lane-aligned tile

    n_blk = 1
    if t_hw == HW and N > 1:
        # Whole spatial extent fits in one tile: pack batch elements per step.
        x_block_bytes = max(C_in * t_hw * itemsize, 1)
        cap = min(
            _MAX_BATCH_BLOCK, N,
            max(1, budget // max(per_col * t_hw, 1)),
            max(1, _TARGET_BLOCK_BYTES // x_block_bytes),
        )
        for d in range(1, cap + 1):              # largest divisor of N <= cap
            if N % d == 0:
                n_blk = d

    # v7x has 2 TensorCores: avoid a single-step grid for non-trivial N==1 work.
    if N == 1 and pl.cdiv(HW, t_hw) == 1 and HW >= 4096:
        t_hw = ((pl.cdiv(HW, 2) + 127) // 128) * 128

    return n_blk, t_hw


def _outconv_kernel(x_ref, w_ref, b_ref, o_ref):
    # x_ref: (n_blk, C_in, t_hw)   w_ref: (C_out, C_in)
    # b_ref: (C_out, 1)            o_ref: (n_blk, C_out, t_hw)
    n_blk, c_in, _ = x_ref.shape
    c_out = w_ref.shape[0]
    b = b_ref[...].astype(jnp.float32)
    use_vpu = (c_in <= 16) and (c_out <= 16)
    if use_vpu:
        wf = w_ref[...].astype(jnp.float32)
    else:
        w = w_ref[...]
    for n in range(n_blk):                       # static unroll, n_blk <= 16
        x = x_ref[n]                             # contiguous (C_in, t_hw) tile
        if use_vpu:
            # Degenerate-K channel mix on the VPU: C_in broadcast FMAs instead
            # of a K=C_in matmul round-tripping the MXU result path.
            xf = x.astype(jnp.float32)
            acc = wf[:, 0:1] * xf[0:1, :]
            for ci in range(1, c_in):
                acc = acc + wf[:, ci:ci + 1] * xf[ci:ci + 1, :]
        else:
            acc = jnp.dot(w, x, preferred_element_type=jnp.float32)
        o_ref[n] = (acc + b).astype(o_ref.dtype)


def outconv_2d(x_nchw, weight, bias):
    """1x1 Conv2d forward (same semantics as nn.Conv2d(C_in, C_out, kernel_size=1)).

    Args:
      x_nchw: (N, C_in, H, W)
      weight: (C_out, C_in, 1, 1)  (PyTorch Conv2d layout)
      bias:   (C_out,)
    Returns:
      (N, C_out, H, W), dtype of x.
    """
    N, C_in, H, W = x_nchw.shape
    C_out = weight.shape[0]
    HW = H * W
    itemsize = jnp.dtype(x_nchw.dtype).itemsize

    # NCHW is already channel-major: these reshapes move no data.
    x = x_nchw.reshape(N, C_in, HW)
    w_mat = weight.reshape(C_out, C_in)
    b_col = bias.reshape(C_out, 1)

    vmem_cap = _vmem_capacity_bytes()
    n_blk, t_hw = _choose_tiling(N, C_in, C_out, HW, itemsize, vmem_cap)
    grid = (pl.cdiv(N, n_blk), pl.cdiv(HW, t_hw))

    # Scoped VMEM: cover the double-buffered blocks plus margin, below physical.
    used = (2 * n_blk * (C_in + C_out) * t_hw + 4 * C_out * (C_in + 1)) * itemsize
    vmem_limit = int(max(32 << 20, min(vmem_cap - (16 << 20), used + (16 << 20))))

    cost = pl.CostEstimate(
        flops=2 * N * HW * C_in * C_out,
        transcendentals=0,
        bytes_accessed=(N * (C_in + C_out) * HW + C_out * (C_in + 1)) * itemsize,
    )

    out = pl.pallas_call(
        _outconv_kernel,
        out_shape=jax.ShapeDtypeStruct((N, C_out, HW), x_nchw.dtype),
        grid_spec=pltpu.PrefetchScalarGridSpec(
            num_scalar_prefetch=0,
            grid=grid,
            in_specs=[
                pl.BlockSpec((n_blk, C_in, t_hw), lambda nb, j: (nb, 0, j)),
                pl.BlockSpec((C_out, C_in), lambda nb, j: (0, 0)),
                pl.BlockSpec((C_out, 1), lambda nb, j: (0, 0)),
            ],
            out_specs=pl.BlockSpec((n_blk, C_out, t_hw), lambda nb, j: (nb, 0, j)),
        ),
        compiler_params=pltpu.CompilerParams(
            dimension_semantics=("parallel", "parallel"),
            vmem_limit_bytes=vmem_limit,
        ),
        cost_estimate=cost,
    )(x, w_mat, b_col)

    return out.reshape(N, C_out, H, W)


def _reference(x_nchw, weight, bias):
    # Pure-JAX reference: lax conv with 1x1 kernel.
    return jax.lax.conv_general_dilated(
        x_nchw, weight, window_strides=(1, 1), padding="VALID",
        dimension_numbers=("NCHW", "OIHW", "NCHW")) + bias[None, :, None, None]


if __name__ == "__main__":
    key = jax.random.PRNGKey(0)
    k_x, k_w, k_b = jax.random.split(key, 3)

    N, C_in, C_out, H, W = 2, 4, 3, 16, 16

    x = jax.random.normal(k_x, (N, C_in, H, W), dtype=jnp.float32)
    # Deterministic param init (kaiming-uniform-ish scale, synthetic weights)
    bound = 1.0 / (C_in ** 0.5)
    weight = jax.random.uniform(k_w, (C_out, C_in, 1, 1), jnp.float32,
                                minval=-bound, maxval=bound)
    bias = jax.random.uniform(k_b, (C_out,), jnp.float32,
                              minval=-bound, maxval=bound)

    y = outconv_2d(x, weight, bias)
    y = jax.block_until_ready(y)

    y_ref = _reference(x, weight, bias)
    assert y.shape == (N, C_out, H, W), y.shape
    assert jnp.allclose(y, y_ref, atol=1e-5, rtol=1e-5), \
        float(jnp.max(jnp.abs(y - y_ref)))

    print("KERNEL_OK")
</pallas_src>

<mosaic_0001>
module attributes {stable_mosaic.version = 11 : i64} {
  func.func @_outconv_kernel(%arg0: i32, %arg1: i32, %arg2: memref<2x4x256xf32, #tpu.memory_space<vmem>>, %arg3: memref<3x4xf32, #tpu.memory_space<vmem>>, %arg4: memref<3x1xf32, #tpu.memory_space<vmem>>, %arg5: memref<2x3x256xf32, #tpu.memory_space<vmem>>) attributes {dimension_semantics = [#tpu.dimension_semantics<parallel>, #tpu.dimension_semantics<parallel>], iteration_bounds = array<i64: 1, 1>, scalar_prefetch = 0 : i64, scratch_operands = 0 : i64, tpu.core_type = #tpu.core_type<tc>, window_params = [{transform_indices = @transform_0, window_bounds = array<i64: 2, 4, 256>}, {pipeline_mode = #tpu.pipeline_mode<synchronous>, transform_indices = @transform_1, window_bounds = array<i64: 3, 4>}, {pipeline_mode = #tpu.pipeline_mode<synchronous>, transform_indices = @transform_2, window_bounds = array<i64: 3, 1>}, {transform_indices = @transform_3, window_bounds = array<i64: 2, 3, 256>}]} {
    %c0 = arith.constant 0 : index
    %c0_0 = arith.constant 0 : index
    %0 = vector.load %arg4[%c0, %c0_0] : memref<3x1xf32, #tpu.memory_space<vmem>>, vector<3x1xf32>
    %c0_1 = arith.constant 0 : index
    %c0_2 = arith.constant 0 : index
    %1 = vector.load %arg3[%c0_1, %c0_2] : memref<3x4xf32, #tpu.memory_space<vmem>>, vector<3x4xf32>
    %c0_3 = arith.constant 0 : index
    %c0_4 = arith.constant 0 : index
    %c0_5 = arith.constant 0 : index
    %2 = vector.load %arg2[%c0_3, %c0_4, %c0_5] : memref<2x4x256xf32, #tpu.memory_space<vmem>>, vector<1x4x256xf32>
    %3 = vector.shape_cast %2 : vector<1x4x256xf32> to vector<4x256xf32>
    %4 = vector.extract_strided_slice %1 {offsets = [0, 0], sizes = [3, 1], strides = [1, 1]} : vector<3x4xf32> to vector<3x1xf32>
    %5 = vector.extract_strided_slice %3 {offsets = [0, 0], sizes = [1, 256], strides = [1, 1]} : vector<4x256xf32> to vector<1x256xf32>
    %6 = vector.broadcast %4 : vector<3x1xf32> to vector<3x256xf32>
    %7 = vector.broadcast %5 : vector<1x256xf32> to vector<3x256xf32>
    %8 = arith.mulf %6, %7 : vector<3x256xf32>
    %9 = vector.extract_strided_slice %1 {offsets = [0, 1], sizes = [3, 1], strides = [1, 1]} : vector<3x4xf32> to vector<3x1xf32>
    %10 = vector.extract_strided_slice %3 {offsets = [1, 0], sizes = [1, 256], strides = [1, 1]} : vector<4x256xf32> to vector<1x256xf32>
    %11 = vector.broadcast %9 : vector<3x1xf32> to vector<3x256xf32>
    %12 = vector.broadcast %10 : vector<1x256xf32> to vector<3x256xf32>
    %13 = arith.mulf %11, %12 : vector<3x256xf32>
    %14 = arith.addf %8, %13 : vector<3x256xf32>
    %15 = vector.extract_strided_slice %1 {offsets = [0, 2], sizes = [3, 1], strides = [1, 1]} : vector<3x4xf32> to vector<3x1xf32>
    %16 = vector.extract_strided_slice %3 {offsets = [2, 0], sizes = [1, 256], strides = [1, 1]} : vector<4x256xf32> to vector<1x256xf32>
    %17 = vector.broadcast %15 : vector<3x1xf32> to vector<3x256xf32>
    %18 = vector.broadcast %16 : vector<1x256xf32> to vector<3x256xf32>
    %19 = arith.mulf %17, %18 : vector<3x256xf32>
    %20 = arith.addf %14, %19 : vector<3x256xf32>
    %21 = vector.extract_strided_slice %1 {offsets = [0, 3], sizes = [3, 1], strides = [1, 1]} : vector<3x4xf32> to vector<3x1xf32>
    %22 = vector.extract_strided_slice %3 {offsets = [3, 0], sizes = [1, 256], strides = [1, 1]} : vector<4x256xf32> to vector<1x256xf32>
    %23 = vector.broadcast %21 : vector<3x1xf32> to vector<3x256xf32>
    %24 = vector.broadcast %22 : vector<1x256xf32> to vector<3x256xf32>
    %25 = arith.mulf %23, %24 : vector<3x256xf32>
    %26 = arith.addf %20, %25 : vector<3x256xf32>
    %27 = vector.broadcast %0 : vector<3x1xf32> to vector<3x256xf32>
    %28 = arith.addf %26, %27 : vector<3x256xf32>
    %c0_6 = arith.constant 0 : index
    %c0_7 = arith.constant 0 : index
    %c0_8 = arith.constant 0 : index
    %29 = vector.load %arg5[%c0_6, %c0_7, %c0_8] : memref<2x3x256xf32, #tpu.memory_space<vmem>>, vector<1x3x256xf32>
    %30 = vector.shape_cast %29 : vector<1x3x256xf32> to vector<3x256xf32>
    %31 = vector.shape_cast %28 : vector<3x256xf32> to vector<1x3x256xf32>
    tpu.vector_store %arg5[%c0_6, %c0_7, %c0_8], %31 {strides = array<i32>} : memref<2x3x256xf32, #tpu.memory_space<vmem>>, vector<1x3x256xf32>,
    %c1 = arith.constant 1 : index
    %c0_9 = arith.constant 0 : index
    %c0_10 = arith.constant 0 : index
    %32 = vector.load %arg2[%c1, %c0_9, %c0_10] : memref<2x4x256xf32, #tpu.memory_space<vmem>>, vector<1x4x256xf32>
    %33 = vector.shape_cast %32 : vector<1x4x256xf32> to vector<4x256xf32>
    %34 = vector.extract_strided_slice %1 {offsets = [0, 0], sizes = [3, 1], strides = [1, 1]} : vector<3x4xf32> to vector<3x1xf32>
    %35 = vector.extract_strided_slice %33 {offsets = [0, 0], sizes = [1, 256], strides = [1, 1]} : vector<4x256xf32> to vector<1x256xf32>
    %36 = vector.broadcast %34 : vector<3x1xf32> to vector<3x256xf32>
    %37 = vector.broadcast %35 : vector<1x256xf32> to vector<3x256xf32>
    %38 = arith.mulf %36, %37 : vector<3x256xf32>
    %39 = vector.extract_strided_slice %1 {offsets = [0, 1], sizes = [3, 1], strides = [1, 1]} : vector<3x4xf32> to vector<3x1xf32>
    %40 = vector.extract_strided_slice %33 {offsets = [1, 0], sizes = [1, 256], strides = [1, 1]} : vector<4x256xf32> to vector<1x256xf32>
    %41 = vector.broadcast %39 : vector<3x1xf32> to vector<3x256xf32>
    %42 = vector.broadcast %40 : vector<1x256xf32> to vector<3x256xf32>
    %43 = arith.mulf %41, %42 : vector<3x256xf32>
    %44 = arith.addf %38, %43 : vector<3x256xf32>
    %45 = vector.extract_strided_slice %1 {offsets = [0, 2], sizes = [3, 1], strides = [1, 1]} : vector<3x4xf32> to vector<3x1xf32>
    %46 = vector.extract_strided_slice %33 {offsets = [2, 0], sizes = [1, 256], strides = [1, 1]} : vector<4x256xf32> to vector<1x256xf32>
    %47 = vector.broadcast %45 : vector<3x1xf32> to vector<3x256xf32>
    %48 = vector.broadcast %46 : vector<1x256xf32> to vector<3x256xf32>
    %49 = arith.mulf %47, %48 : vector<3x256xf32>
    %50 = arith.addf %44, %49 : vector<3x256xf32>
    %51 = vector.extract_strided_slice %1 {offsets = [0, 3], sizes = [3, 1], strides = [1, 1]} : vector<3x4xf32> to vector<3x1xf32>
    %52 = vector.extract_strided_slice %33 {offsets = [3, 0], sizes = [1, 256], strides = [1, 1]} : vector<4x256xf32> to vector<1x256xf32>
    %53 = vector.broadcast %51 : vector<3x1xf32> to vector<3x256xf32>
    %54 = vector.broadcast %52 : vector<1x256xf32> to vector<3x256xf32>
    %55 = arith.mulf %53, %54 : vector<3x256xf32>
    %56 = arith.addf %50, %55 : vector<3x256xf32>
    %57 = vector.broadcast %0 : vector<3x1xf32> to vector<3x256xf32>
    %58 = arith.addf %56, %57 : vector<3x256xf32>
    %c1_11 = arith.constant 1 : index
    %c0_12 = arith.constant 0 : index
    %c0_13 = arith.constant 0 : index
    %59 = vector.load %arg5[%c1_11, %c0_12, %c0_13] : memref<2x3x256xf32, #tpu.memory_space<vmem>>, vector<1x3x256xf32>
    %60 = vector.shape_cast %59 : vector<1x3x256xf32> to vector<3x256xf32>
    %61 = vector.shape_cast %58 : vector<3x256xf32> to vector<1x3x256xf32>
    tpu.vector_store %arg5[%c1_11, %c0_12, %c0_13], %61 {strides = array<i32>} : memref<2x3x256xf32, #tpu.memory_space<vmem>>, vector<1x3x256xf32>,
    return
  }
  func.func @transform_0(%arg0: i32, %arg1: i32) -> (i32, i32, i32) {
    %c0_i32 = arith.constant 0 : i32
    %c0_i32_0 = arith.constant 0 : i32
    return %arg0, %c0_i32, %arg1 : i32, i32, i32
  }
  func.func @transform_1(%arg0: i32, %arg1: i32) -> (i32, i32) {
    %c0_i32 = arith.constant 0 : i32
    %c0_i32_0 = arith.constant 0 : i32
    %c0_i32_1 = arith.constant 0 : i32
    return %c0_i32, %c0_i32_0 : i32, i32
  }
  func.func @transform_2(%arg0: i32, %arg1: i32) -> (i32, i32) {
    %c0_i32 = arith.constant 0 : i32
    %c0_i32_0 = arith.constant 0 : i32
    %c0_i32_1 = arith.constant 0 : i32
    return %c0_i32, %c0_i32_0 : i32, i32
  }
  func.func @transform_3(%arg0: i32, %arg1: i32) -> (i32, i32, i32) {
    %c0_i32 = arith.constant 0 : i32
    %c0_i32_0 = arith.constant 0 : i32
    return %arg0, %c0_i32, %arg1 : i32, i32, i32
  }
}

</mosaic_0001>

<bundles_post_ra>
// kernel: tpu_custom_call.1
= control target key start
LH: loop header
LB: loop body
LE: loop exit
PB: predicated region body
PF: predicated region fallthrough
CT: control target
= control target key end

     0   :  { %8 = vsyncpa [#allocation3], 0  ;;  %s287_s12 = smov [#allocation2]   ;;  %s338_s0 = inlined_call_operand.hbm [shape: f32[2,4,256], index: 0, kind: input, shape index: {}]   ;;  %s339_s1 = inlined_call_operand.vmem [shape: f32[3,4], index: 1, kind: input, shape index: {}]   ;;  %s340_s2 = inlined_call_operand.vmem [shape: f32[3,1], index: 2, kind: input, shape index: {}]   ;;  %s341_s3 = inlined_call_operand.vmem [shape: f32[2,3,256], index: 3, kind: output, shape index: {}]  }
   0x1   :  { %s14_s13 = sshll.u32 %s287_s12, 4  ;;  %s263_s16 = scalar_lea.hbm %s338_s0, 256  ;;  %s15_s13 = int_to_ptr.vmem [resolvable:$true] %s14_s13 }
   0x2   :  { %p264_p0 = scmp.ne.s32.totalorder %s338_s0, %s263_s16  ;;  %p267_p1 = scmp.lt.u32.totalorder %s263_s16, %s338_s0 }
   0x4   :  { %p269_p2 = pnand %p267_p1, %p264_p0 }
   0x6   :  { %272 = shalt.err (!%p269_p2)
}
   0x7   :  { %s273_s21 = scalar_lea.vmem %s15_s13, 256  ;;  %p278_p4 = scmp.lt.s32.totalorder %s15_s13, %s15_s13 }
   0x8   :  { %p274_p3 = scmp.ne.s32.totalorder %s15_s13, %s273_s21  ;;  %p279_p5 = scmp.lt.s32.totalorder %s273_s21, %s273_s21 }
   0xa   :  { %p280_p6 = por %p279_p5, %p278_p4 }
   0xc   :  { %p281_p7 = pnand %p280_p6, %p274_p3 }
   0xe   :  { %284 = shalt.err (!%p281_p7)
}
   0xf   :  { %s288_s22 = smov 128   ;;  %s289_s23 = smov 8  }
  0x10   :  { %20 = dma.hbm_to_vmem [thread:$0]  %s338_s0, 256, %s15_s13, [#allocation3], %s288_s22, %s288_s22, %s289_s23  }
  0x11   :  { %285 = dma.done.wait [#allocation3], 256  }
  0x12   :  { %286 = vsyncadd [#allocation3], 4294967040  ;;  %v290_v0 = vmov 0   ;;  %v291_v1 = vmov 2   ;;  %v29_v2 = vld [vmem:[%s339_s1] sm:$0x7]  ;;  %v37_v6 = vlaneseq }
  0x13   :  { %257 = vset.pattern.permute.xlu0 %v290_v0  ;;  %259 = vset.pattern.permute.xlu1 %v291_v1  ;;  %v292_v3 = vmov 1   ;;  %v293_v4 = vmov 3   ;;  %v28_v5 = vld [vmem:[%s340_s2] sm:$0x7]  ;;  %v148_v11 = vld [vmem:[#allocation2 + $0x8] sm:$0xff] }
  0x14   :  { %33 = vperm.xlu0 %257, %v29_v2   ;;  %84 = vperm.xlu1 %259, %v29_v2   ;;  %v38_v7 = vshrl.u32 %v37_v6, 7  ;;  %v30_v10 = vld [vmem:[#allocation2] sm:$0xff] }
  0x16   :  { %v39_v8 = vsub.s32 0, %v38_v7  ;;  %v43_v9 = vsub.s32 4, %v38_v7  ;;  %v89_v12 = vsub.s32 2, %v38_v7  ;;  %v93_v13 = vsub.s32 6, %v38_v7 }
  0x17   :  { %v63_v14 = vsub.s32 1, %v38_v7  ;;  %v67_v15 = vsub.s32 5, %v38_v7  ;;  %v115_v16 = vsub.s32 3, %v38_v7  ;;  %v119_v17 = vsub.s32 7, %v38_v7 }
  0x18   :  { %258 = vset.pattern.permute.xlu0 %v292_v3  ;;  %260 = vset.pattern.permute.xlu1 %v293_v4  ;;  %v40_v18 = vrot.slane %v30_v10, %v39_v8  ;;  %v44_v19 = vrot.slane %v30_v10, %v43_v9  ;;  %v153_v20 = vrot.slane %v148_v11, %v39_v8 }
  0x19   :  { %58 = vperm.xlu0 %258, %v29_v2   ;;  %110 = vperm.xlu1 %260, %v29_v2   ;;  %v157_v21 = vrot.slane %v148_v11, %v43_v9  ;;  %v90_v22 = vrot.slane %v30_v10, %v89_v12  ;;  %v94_v23 = vrot.slane %v30_v10, %v93_v13 }
  0x1a   :  { %v195_v24 = vrot.slane %v148_v11, %v89_v12  ;;  %v199_v25 = vrot.slane %v148_v11, %v93_v13  ;;  %v64_v26 = vrot.slane %v30_v10, %v63_v14  ;;  %v68_v27 = vrot.slane %v30_v10, %v67_v15 }
  0x1b   :  { %v173_v28 = vrot.slane %v148_v11, %v63_v14  ;;  %v177_v29 = vrot.slane %v148_v11, %v67_v15  ;;  %v116_v30 = vrot.slane %v30_v10, %v115_v16  ;;  %v120_v31 = vrot.slane %v30_v10, %v119_v17 }
  0x1c   :  { %v217_v32 = vrot.slane %v148_v11, %v115_v16  ;;  %v221_v33 = vrot.slane %v148_v11, %v119_v17  ;;  %v50_v34 = vrot.slane %v40_v18, %v39_v8  ;;  %v54_v35 = vrot.slane %v44_v19, %v39_v8 }
  0x1d   :  { %261 = vset.pattern.permute.xlu1 %v290_v0  ;;  %262 = vset.pattern.permute.xlu0 %v290_v0  ;;  %v163_v36 = vrot.slane %v153_v20, %v39_v8  ;;  %v167_v37 = vrot.slane %v157_v21, %v39_v8  ;;  %v100_v40 = vrot.slane %v90_v22, %v89_v12 }
  0x1e   :  { %137 = vperm.xlu1 %261, %v28_v5   ;;  %v104_v41 = vrot.slane %v94_v23, %v89_v12  ;;  %v205_v42 = vrot.slane %v195_v24, %v89_v12  ;;  %v209_v43 = vrot.slane %v199_v25, %v89_v12  ;;  %v74_v44 = vrot.slane %v64_v26, %v63_v14 }
  0x1f   :  { %v78_v45 = vrot.slane %v68_v27, %v63_v14  ;;  %v183_v46 = vrot.slane %v173_v28, %v63_v14  ;;  %v187_v47 = vrot.slane %v177_v29, %v63_v14  ;;  %v126_v48 = vrot.slane %v116_v30, %v115_v16 }
  0x20   :  { %v130_v49 = vrot.slane %v120_v31, %v115_v16  ;;  %v227_v50 = vrot.slane %v217_v32, %v115_v16  ;;  %v231_v51 = vrot.slane %v221_v33, %v115_v16 }
  0x93   :  { %v34_v38 = vpop.permute.xlu0 %33  ;;  %v85_v39 = vpop.permute.xlu1 %84 }
  0x94   :  { %v55_v52 = vmul.f32 %v50_v34, %v34_v38  ;;  %v56_v53 = vmul.f32 %v54_v35, %v34_v38  ;;  %v168_v54 = vmul.f32 %v163_v36, %v34_v38  ;;  %v169_v55 = vmul.f32 %v167_v37, %v34_v38 }
  0x95   :  { %v105_v56 = vmul.f32 %v100_v40, %v85_v39  ;;  %v106_v57 = vmul.f32 %v104_v41, %v85_v39  ;;  %v210_v58 = vmul.f32 %v205_v42, %v85_v39  ;;  %v211_v59 = vmul.f32 %v209_v43, %v85_v39 }
  0x98   :  { %v59_v60 = vpop.permute.xlu0 %58  ;;  %v111_v61 = vpop.permute.xlu1 %110 }
  0x99   :  { %v79_v62 = vmul.f32 %v74_v44, %v59_v60  ;;  %v80_v63 = vmul.f32 %v78_v45, %v59_v60  ;;  %v188_v0 = vmul.f32 %v183_v46, %v59_v60  ;;  %v189_v1 = vmul.f32 %v187_v47, %v59_v60 }
  0x9a   :  { %v131_v2 = vmul.f32 %v126_v48, %v111_v61  ;;  %v132_v3 = vmul.f32 %v130_v49, %v111_v61  ;;  %v232_v4 = vmul.f32 %v227_v50, %v111_v61  ;;  %v233_v5 = vmul.f32 %v231_v51, %v111_v61 }
  0x9b   :  { %v81_v6 = vadd.f32 %v79_v62, %v55_v52  ;;  %v82_v7 = vadd.f32 %v80_v63, %v56_v53  ;;  %v190_v8 = vadd.f32 %v188_v0, %v168_v54  ;;  %v191_v9 = vadd.f32 %v189_v1, %v169_v55 }
  0x9d   :  { %v107_v10 = vadd.f32 %v105_v56, %v81_v6  ;;  %v108_v11 = vadd.f32 %v106_v57, %v82_v7  ;;  %v212_v12 = vadd.f32 %v210_v58, %v190_v8  ;;  %v213_v13 = vadd.f32 %v211_v59, %v191_v9  ;;  %v138_v14 = vpop.permute.xlu1 %137 }
  0x9f   :  { %v133_v15 = vadd.f32 %v131_v2, %v107_v10  ;;  %v134_v16 = vadd.f32 %v132_v3, %v108_v11  ;;  %v234_v17 = vadd.f32 %v232_v4, %v212_v12  ;;  %v235_v18 = vadd.f32 %v233_v5, %v213_v13 }
  0xa1   :  { %v140_v19 = vadd.f32 %v138_v14, %v133_v15  ;;  %v141_v20 = vadd.f32 %v138_v14, %v134_v16  ;;  %v236_v21 = vadd.f32 %v234_v17, %v138_v14  ;;  %v237_v22 = vadd.f32 %v235_v18, %v138_v14 }
  0xa3   :  { %v144_v23 = vcombine.low %v140_v19, %v141_v20  ;;  %v240_v24 = vcombine.low %v236_v21, %v237_v22 }
  0xa5   :  { %146 = vst [vmem:[%s341_s3] sm:$0x77] %v144_v23  ;;  %249 = vst [vmem:[%s341_s3 + $0x8] sm:$0x77] %v240_v24 }
  0xa6   :  { %248 = vsyncpa [#allocation3], 1 }

</bundles_post_ra>
